<compile_context>
chip_gen: v6e
topology: v6e:2x2x1
jax: 0.10.0
libtpu: 0.0.40
codegen_flags: <defaults>
</compile_context>

<pallas_src>
import functools
import math

import jax
import jax.numpy as jnp
from jax.experimental import pallas as pl
from jax.experimental.pallas import tpu as pltpu


def make_positional_encoding_table(d_model, max_len=5000, dtype=jnp.float32):
    """Deterministic buffer construction, identical math to the torch __init__."""
    position = jnp.arange(max_len, dtype=jnp.float32)[:, None]            # (max_len, 1)
    div_term = jnp.exp(jnp.arange(0, d_model, 2, dtype=jnp.float32)
                       * (-math.log(10000.0) / d_model))                  # (d_model/2,)
    pe = jnp.zeros((max_len, d_model), dtype=jnp.float32)
    pe = pe.at[:, 0::2].set(jnp.sin(position * div_term))
    pe = pe.at[:, 1::2].set(jnp.cos(position * div_term))
    return pe[:, None, :].astype(dtype)                                   # (max_len, 1, d_model)


def _pe_add_kernel(x_ref, pe_ref, o_ref, *, batch):
    # x_ref/o_ref: (ts, B*D) lane-dense; pe_ref: (ts, D) in the compute dtype.
    pe = pe_ref[...]
    if batch > 1:
        # Row s of the (S, B*D) view is [x[s,0,:], ..., x[s,B-1,:]], so the
        # matching pe row is B lane-concatenated copies of pe[s].
        pe = jnp.concatenate([pe] * batch, axis=-1)
    o_ref[...] = (x_ref[...] + pe).astype(o_ref.dtype)


def _pe_add_dropout_kernel(x_ref, pe_ref, bits_ref, o_ref, *, batch, threshold, scale):
    # Inverted dropout fused with the positional-encoding add.
    pe = pe_ref[...]
    if batch > 1:
        pe = jnp.concatenate([pe] * batch, axis=-1)
    y = x_ref[...] + pe
    # Integer-threshold compare on raw bits: P(drop) = threshold / 2**32.
    keep = bits_ref[...] >= jnp.uint32(threshold)
    o_ref[...] = jnp.where(keep, y * scale, jnp.zeros_like(y)).astype(o_ref.dtype)


def _tile_rows(S, bytes_per_row, target_bytes):
    """Pick a row-tile size of ~target_bytes, keeping the sublane axis full."""
    ts = max(1, min(S, target_bytes // max(1, bytes_per_row)))
    if ts < S:
        ts = max(8, (ts // 8) * 8)   # multiple of 8 sublanes -> unmasked stores
        ts = min(ts, S)
    return int(ts)


def positional_encoding_forward(x, pe, *, p=0.1, training=False, rng_key=None,
                                target_tile_bytes=2 * 1024 * 1024):
    """x: (S, B, D); pe: (max_len, 1, D). Returns (S, B, D)."""
    S, B, D = x.shape
    compute_dtype = x.dtype
    itemsize = x.dtype.itemsize

    # Cast pe once (avoids an f32 pe stream + implicit upcast when x is bf16).
    pe2 = pe[:S, 0, :].astype(compute_dtype)            # (S, D)

    # Lane-dense, sublane-full 2D view of x (free reshape of the row-major array).
    xw = x.reshape(S, B * D)

    ts = _tile_rows(S, B * D * itemsize, target_tile_bytes)
    grid = (pl.cdiv(S, ts),)

    x_spec = pl.BlockSpec((ts, B * D), lambda i: (i, 0))
    pe_spec = pl.BlockSpec((ts, D), lambda i: (i, 0))
    out_spec = pl.BlockSpec((ts, B * D), lambda i: (i, 0))
    out_shape = jax.ShapeDtypeStruct((S, B * D), compute_dtype)

    # Double-buffered footprint: 2*(x + out + bits) tiles + 2 small pe tiles.
    tile_bytes = ts * B * D * itemsize
    vmem_limit = int(min(max(8 * tile_bytes + (2 << 20), 16 << 20), 48 << 20))
    cparams = pltpu.CompilerParams(
        dimension_semantics=("parallel",),               # v7x: shard blocks over 2 TCs
        vmem_limit_bytes=vmem_limit,
    )

    n_elem = S * B * D
    if (not training) or p == 0.0:
        # Eval-mode forward: exactly x + pe[:S] (dropout is identity).
        cost = pl.CostEstimate(flops=n_elem, transcendentals=0,
                               bytes_accessed=2 * n_elem * itemsize + S * D * itemsize)
        kernel = functools.partial(_pe_add_kernel, batch=B)
        out = pl.pallas_call(
            kernel,
            out_shape=out_shape,
            grid=grid,
            in_specs=[x_spec, pe_spec],
            out_specs=out_spec,
            compiler_params=cparams,
            cost_estimate=cost,
            input_output_aliases={0: 0},
        )(xw, pe2)
        return out.reshape(S, B, D)

    if rng_key is None:
        rng_key = jax.random.PRNGKey(0)
    bits = jax.random.bits(rng_key, (S, B * D), dtype=jnp.uint32)
    bits_spec = pl.BlockSpec((ts, B * D), lambda i: (i, 0))
    threshold = min(int(round(p * float(2 ** 32))), 2 ** 32 - 1)
    kernel = functools.partial(_pe_add_dropout_kernel, batch=B,
                               threshold=threshold, scale=1.0 / (1.0 - p))
    cost = pl.CostEstimate(flops=3 * n_elem, transcendentals=0,
                           bytes_accessed=2 * n_elem * itemsize
                           + S * D * itemsize + 4 * n_elem)
    out = pl.pallas_call(
        kernel,
        out_shape=out_shape,
        grid=grid,
        in_specs=[x_spec, pe_spec, bits_spec],
        out_specs=out_spec,
        compiler_params=cparams,
        cost_estimate=cost,
        input_output_aliases={0: 0},
    )(xw, pe2, bits)
    return out.reshape(S, B, D)


if __name__ == "__main__":
    S, B, D = 8, 2, 32                          # seq=8, batch=2, d_model=32
    max_len = 64

    key = jax.random.PRNGKey(0)
    x = jax.random.normal(key, (S, B, D), dtype=jnp.float32)
    pe = make_positional_encoding_table(D, max_len=max_len)

    ref = x + pe[:S]                            # pure-JAX reference (pe broadcasts over batch)
    x_train = x + 0.0                           # separate buffer (x may be alias-donated)

    # Eval-mode forward (dropout == identity): must match x + pe[:S].
    out_eval = jax.block_until_ready(
        positional_encoding_forward(x, pe, p=0.1, training=False))
    assert out_eval.shape == (S, B, D) and out_eval.dtype == x.dtype
    assert jnp.allclose(out_eval, ref, atol=1e-6, rtol=1e-6)

    # Training-mode forward (fused dropout).
    out_train = jax.block_until_ready(
        positional_encoding_forward(x_train, pe, p=0.1, training=True,
                                    rng_key=jax.random.PRNGKey(42)))
    assert out_train.shape == (S, B, D)
    scaled = ref / (1.0 - 0.1)
    ok = jnp.all(jnp.isclose(out_train, scaled, atol=1e-5, rtol=1e-5) | (out_train == 0.0))
    assert bool(ok)
    assert bool(jnp.any(out_train != 0.0))

    print("KERNEL_OK")
</pallas_src>

<mosaic_0001>
module attributes {stable_mosaic.version = 11 : i64} {
  func.func @_pe_add_kernel(%arg0: i32, %arg1: memref<8x64xf32, #tpu.memory_space<vmem>>, %arg2: memref<8x32xf32, #tpu.memory_space<vmem>>, %arg3: memref<8x64xf32, #tpu.memory_space<vmem>>) attributes {dimension_semantics = [#tpu.dimension_semantics<parallel>], iteration_bounds = array<i64: 1>, scalar_prefetch = 0 : i64, scratch_operands = 0 : i64, tpu.core_type = #tpu.core_type<tc>, window_params = [{transform_indices = @transform_0, window_bounds = array<i64: 8, 64>}, {transform_indices = @transform_1, window_bounds = array<i64: 8, 32>}, {transform_indices = @transform_2, window_bounds = array<i64: 8, 64>}]} {
    %c0 = arith.constant 0 : index
    %c0_0 = arith.constant 0 : index
    %0 = vector.load %arg2[%c0, %c0_0] : memref<8x32xf32, #tpu.memory_space<vmem>>, vector<8x32xf32>
    %1 = tpu.concatenate %0, %0 in 1 : vector<8x32xf32>, vector<8x32xf32> -> vector<8x64xf32>
    %c0_1 = arith.constant 0 : index
    %c0_2 = arith.constant 0 : index
    %2 = vector.load %arg1[%c0_1, %c0_2] : memref<8x64xf32, #tpu.memory_space<vmem>>, vector<8x64xf32>
    %3 = arith.addf %2, %1 : vector<8x64xf32>
    %c0_3 = arith.constant 0 : index
    %c0_4 = arith.constant 0 : index
    %4 = vector.load %arg3[%c0_3, %c0_4] : memref<8x64xf32, #tpu.memory_space<vmem>>, vector<8x64xf32>
    tpu.vector_store %arg3[%c0_3, %c0_4], %3 {strides = array<i32>} : memref<8x64xf32, #tpu.memory_space<vmem>>, vector<8x64xf32>,
    return
  }
  func.func @transform_0(%arg0: i32) -> (i32, i32) {
    %c0_i32 = arith.constant 0 : i32
    %c0_i32_0 = arith.constant 0 : i32
    return %arg0, %c0_i32 : i32, i32
  }
  func.func @transform_1(%arg0: i32) -> (i32, i32) {
    %c0_i32 = arith.constant 0 : i32
    %c0_i32_0 = arith.constant 0 : i32
    return %arg0, %c0_i32 : i32, i32
  }
  func.func @transform_2(%arg0: i32) -> (i32, i32) {
    %c0_i32 = arith.constant 0 : i32
    %c0_i32_0 = arith.constant 0 : i32
    return %arg0, %c0_i32 : i32, i32
  }
}

</mosaic_0001>

<bundles_post_ra>
// kernel: tpu_custom_call.1
= control target key start
LH: loop header
LB: loop body
LE: loop exit
PB: predicated region body
PF: predicated region fallthrough
CT: control target
= control target key end

     0   :  { %7 = vsyncpa [#allocation3], 0  ;;  %s124_s0 = inlined_call_operand.hbm [shape: f32[8,64], index: 0, kind: input, shape index: {}, may-alias: {0,2}]   ;;  %s125_s1 = inlined_call_operand.vmem [shape: f32[8,32], index: 1, kind: input, shape index: {}]   ;;  %s126_s2 = inlined_call_operand.hbm [shape: f32[8,64], index: 2, kind: output, shape index: {}, may-alias: {0,2}]  }
   0x1   :  { %8 = vsyncpa [#allocation4], 0  ;;  %s97_s9 = smov [#allocation2]  }
   0x2   :  { %s15_s10 = sshll.u32 %s97_s9, 4  ;;  %s16_s10 = int_to_ptr.vmem [resolvable:$true] %s15_s10 }
   0x3   :  { %s61_s11 = scalar_lea.vmem %s16_s10, 128  ;;  %p66_p1 = scmp.lt.s32.totalorder %s16_s10, %s16_s10 }
   0x4   :  { %p62_p0 = scmp.ne.s32.totalorder %s16_s10, %s61_s11  ;;  %p67_p2 = scmp.lt.s32.totalorder %s61_s11, %s61_s11 }
   0x6   :  { %p68_p3 = por %p67_p2, %p66_p1 }
   0x8   :  { %p69_p4 = pnand %p68_p3, %p62_p0 }
   0xa   :  { %72 = shalt.err (!%p69_p4)
}
   0xb   :  { %18 = dma.hbm_to_vmem [thread:$0]  %s124_s0, 128, %s16_s10, [#allocation3]  }
   0xc   :  { %93 = dma.done.wait [#allocation3], 128  }
   0xd   :  { %94 = vsyncadd [#allocation3], 4294967168  ;;  %v24_v0 = vld [vmem:[%s125_s1] sm:$0xff]  ;;  %s98_s16 = smov 32   ;;  %vm29_vm0 = vcmask 261120   ;;  %s99_s17 = smov [#allocation5]  }
   0xe   :  { %26 = vrot.lane.b32.xlu0 %v24_v0, %s98_s16  ;;  %v31_v1 = vld [vmem:[#allocation2] sm:$0xff]  ;;  %s41_s18 = sshll.u32 %s99_s17, 4  ;;  %vm33_vm1 = vcmask 523264   ;;  %s42_s18 = int_to_ptr.vmem [resolvable:$true] %s41_s18 }
   0xf   :  { %s73_s19 = scalar_lea.vmem %s42_s18, 128  ;;  %p78_p6 = scmp.lt.s32.totalorder %s42_s18, %s42_s18 }
  0x10   :  { %p74_p5 = scmp.ne.s32.totalorder %s42_s18, %s73_s19  ;;  %p79_p7 = scmp.lt.s32.totalorder %s73_s19, %s73_s19 }
  0x12   :  { %p80_p8 = por %p79_p7, %p78_p6 }
  0x14   :  { %p81_p9 = pnand %p80_p8, %p74_p5 }
  0x80   :  { %v27_v2 = vpop.permute.xlu0 %26 }
  0x81   :  { %v30_v3 = vsel %vm29_vm0, %v24_v0, %v27_v2 }
  0x82   :  { %v32_v4 = vadd.f32 %v31_v1, %v30_v3 }
  0x84   :  { %34 = vst.msk [vmem:[#allocation5] sm:$0xff] %vm33_vm1, %v32_v4 }
  0x85   :  { %84 = shalt.err (!%p81_p9)
}
  0x86   :  { %44 = dma.vmem_to_hbm [thread:$0]  %s42_s18, 128, %s126_s2, [#allocation4]  }
  0x87   :  { %95 = dma.done.wait [#allocation4], 128  }
  0x88   :  { %96 = vsyncadd [#allocation4], 4294967168 }
  0x89   :  { %48 = vsyncpa [#allocation3], 1 }
  0x8a   :  { %49 = vsyncpa [#allocation4], 1 }

</bundles_post_ra>
